<compile_context>
chip_gen: v7x
topology: tpu7x:2x2x1
jax: 0.10.0
libtpu: 0.0.40
codegen_flags: <defaults>
</compile_context>

<pallas_src>
import functools

import jax
import jax.numpy as jnp
from jax.experimental import pallas as pl
from jax.experimental.pallas import tpu as pltpu


def mlp_kernel(x_ref, w1_ref, b1_ref, w2_ref, b2_ref, w3_ref, b3_ref, o_ref):
    x = x_ref[...]

    # fc1 + relu
    h1 = jnp.dot(x, w1_ref[...], preferred_element_type=jnp.float32) + b1_ref[...]
    h1 = jnp.maximum(h1, 0.0)

    # fc2 + relu
    h2 = jnp.dot(h1, w2_ref[...], preferred_element_type=jnp.float32) + b2_ref[...]
    h2 = jnp.maximum(h2, 0.0)

    # fc3 + softmax over the true action dim (no padded lanes).
    logits = jnp.dot(h2, w3_ref[...], preferred_element_type=jnp.float32) + b3_ref[...]
    m = jnp.max(logits, axis=-1, keepdims=True)
    e = jnp.exp(logits - m)
    # Exact division: kernel is DMA/overhead-bound, so the approx reciprocal
    # saves nothing and would cost row-sum accuracy.
    o_ref[...] = (e / jnp.sum(e, axis=-1, keepdims=True)).astype(o_ref.dtype)


def _round_up(x, m):
    return (x + m - 1) // m * m


def _cdiv(a, b):
    return (a + b - 1) // b


def prepare_params(params):
    """One-time (per param update) transpose to (in, out) layout + 2-D biases.

    Hoisted out of mlp_forward so the per-step rollout path launches only the
    Pallas kernel, with no pad/transpose XLA kernels per call.
    """
    return {
        "w1": jnp.asarray(params["w1"]).T,          # (state, hidden)
        "b1": jnp.asarray(params["b1"])[None, :],   # (1, hidden)
        "w2": jnp.asarray(params["w2"]).T,          # (hidden, hidden)
        "b2": jnp.asarray(params["b2"])[None, :],   # (1, hidden)
        "w3": jnp.asarray(params["w3"]).T,          # (hidden, action)
        "b3": jnp.asarray(params["b3"])[None, :],   # (1, action)
    }


def _default_min_tiles():
    """v7x has 2 TensorCores/chip: want >=2 balanced tiles on the 'parallel'
    batch axis for large batches.  Single-core v5e/v6e prefer one big tile."""
    try:
        kind = jax.devices()[0].device_kind.lower()
        if "v7" in kind:
            return 2
    except Exception:
        pass
    return 1


@functools.partial(jax.jit, static_argnames=("block_batch", "min_tiles"))
def mlp_forward(x, prep, *, block_batch=2048, min_tiles=1):
    """x: (batch, state_dim) float32.  prep: output of prepare_params()."""
    batch, state_dim = x.shape
    hidden_dim = prep["w1"].shape[1]
    action_dim = prep["w3"].shape[1]

    # Balanced batch tiling: nt tiles of tb rows each (tb a multiple of 8).
    nt = max(_cdiv(batch, block_batch), min(min_tiles, _cdiv(batch, 8)))
    tb = _round_up(_cdiv(batch, nt), 8)
    bp = nt * tb
    xp = x if bp == batch else jnp.pad(x, ((0, bp - batch), (0, 0)))

    def resident(shape):  # same block every grid step -> stays resident in VMEM
        return pl.BlockSpec(shape, lambda i: (0, 0))

    out = pl.pallas_call(
        mlp_kernel,
        out_shape=jax.ShapeDtypeStruct((bp, action_dim), jnp.float32),
        grid=(nt,),
        in_specs=[
            pl.BlockSpec((tb, state_dim), lambda i: (i, 0)),
            resident((state_dim, hidden_dim)), resident((1, hidden_dim)),
            resident((hidden_dim, hidden_dim)), resident((1, hidden_dim)),
            resident((hidden_dim, action_dim)), resident((1, action_dim)),
        ],
        out_specs=pl.BlockSpec((tb, action_dim), lambda i: (i, 0)),
        compiler_params=pltpu.CompilerParams(
            dimension_semantics=("parallel",),   # shard batch tiles across TCs (v7x)
            vmem_limit_bytes=32 * 1024 * 1024,   # v7x-safe; usage is far below this
        ),
    )(xp, prep["w1"], prep["b1"], prep["w2"], prep["b2"], prep["w3"], prep["b3"])

    return out[:batch]


def init_params(key, state_dim, action_dim, hidden_dim):
    """Deterministic synthetic init mirroring nn.Linear parameter shapes."""
    ks = jax.random.split(key, 6)

    def lin(kw, kb, fan_in, fan_out):
        bound = 1.0 / jnp.sqrt(fan_in)
        w = jax.random.uniform(kw, (fan_out, fan_in), jnp.float32, -bound, bound)
        b = jax.random.uniform(kb, (fan_out,), jnp.float32, -bound, bound)
        return w, b

    w1, b1 = lin(ks[0], ks[1], state_dim, hidden_dim)
    w2, b2 = lin(ks[2], ks[3], hidden_dim, hidden_dim)
    w3, b3 = lin(ks[4], ks[5], hidden_dim, action_dim)
    return {"w1": w1, "b1": b1, "w2": w2, "b2": b2, "w3": w3, "b3": b3}


def _reference(x, params):
    h1 = jnp.maximum(x @ params["w1"].T + params["b1"], 0.0)
    h2 = jnp.maximum(h1 @ params["w2"].T + params["b2"], 0.0)
    return jax.nn.softmax(h2 @ params["w3"].T + params["b3"], axis=1)


if __name__ == "__main__":
    key = jax.random.PRNGKey(0)
    state_dim, action_dim, hidden_dim = 4, 2, 32

    kx, kp, kx2, kx3 = jax.random.split(key, 4)
    params = init_params(kp, state_dim, action_dim, hidden_dim)
    prep = prepare_params(params)            # hoisted out of the per-call path
    min_tiles = _default_min_tiles()

    # Small case (matches the original toy shapes).
    batch = 8
    x = jax.random.normal(kx, (batch, state_dim), jnp.float32)
    out = jax.block_until_ready(mlp_forward(x, prep, min_tiles=min_tiles))
    ref = _reference(x, params)
    assert out.shape == (batch, action_dim)
    # tolerance covers default-precision MXU (bf16 operand truncation)
    assert jnp.allclose(out, ref, atol=2e-3), "mismatch vs reference (small batch)"
    assert jnp.allclose(jnp.sum(out, axis=1), 1.0, atol=1e-5)

    # Larger batch exercises the pipelined, multi-tile batch grid.
    big_batch = 1024
    xb = jax.random.normal(kx2, (big_batch, state_dim), jnp.float32)
    outb = jax.block_until_ready(
        mlp_forward(xb, prep, block_batch=256, min_tiles=min_tiles))
    refb = _reference(xb, params)
    assert outb.shape == (big_batch, action_dim)
    assert jnp.allclose(outb, refb, atol=2e-3), "mismatch vs reference (big batch)"
    assert jnp.allclose(jnp.sum(outb, axis=1), 1.0, atol=1e-5)

    # Awkward batch size exercises the balanced tiling (2 tiles of 264 rows,
    # only 8 rows of padding, instead of padding 520 -> 1024).
    odd_batch = 520
    xc = jax.random.normal(kx3, (odd_batch, state_dim), jnp.float32)
    outc = jax.block_until_ready(
        mlp_forward(xc, prep, block_batch=512, min_tiles=min_tiles))
    refc = _reference(xc, params)
    assert outc.shape == (odd_batch, action_dim)
    assert jnp.allclose(outc, refc, atol=2e-3), "mismatch vs reference (odd batch)"
    assert jnp.allclose(jnp.sum(outc, axis=1), 1.0, atol=1e-5)

    print("KERNEL_OK")
</pallas_src>

<mosaic_0001>
module attributes {stable_mosaic.version = 11 : i64} {
  func.func @mlp_kernel(%arg0: i32, %arg1: memref<8x4xf32, #tpu.memory_space<vmem>>, %arg2: memref<4x32xf32, #tpu.memory_space<vmem>>, %arg3: memref<1x32xf32, #tpu.memory_space<vmem>>, %arg4: memref<32x32xf32, #tpu.memory_space<vmem>>, %arg5: memref<1x32xf32, #tpu.memory_space<vmem>>, %arg6: memref<32x2xf32, #tpu.memory_space<vmem>>, %arg7: memref<1x2xf32, #tpu.memory_space<vmem>>, %arg8: memref<8x2xf32, #tpu.memory_space<vmem>>) attributes {dimension_semantics = [#tpu.dimension_semantics<parallel>], iteration_bounds = array<i64: 1>, scalar_prefetch = 0 : i64, scratch_operands = 0 : i64, tpu.core_type = #tpu.core_type<tc>, window_params = [{transform_indices = @transform_0, window_bounds = array<i64: 8, 4>}, {pipeline_mode = #tpu.pipeline_mode<synchronous>, transform_indices = @transform_1, window_bounds = array<i64: 4, 32>}, {pipeline_mode = #tpu.pipeline_mode<synchronous>, transform_indices = @transform_2, window_bounds = array<i64: 1, 32>}, {pipeline_mode = #tpu.pipeline_mode<synchronous>, transform_indices = @transform_3, window_bounds = array<i64: 32, 32>}, {pipeline_mode = #tpu.pipeline_mode<synchronous>, transform_indices = @transform_4, window_bounds = array<i64: 1, 32>}, {pipeline_mode = #tpu.pipeline_mode<synchronous>, transform_indices = @transform_5, window_bounds = array<i64: 32, 2>}, {pipeline_mode = #tpu.pipeline_mode<synchronous>, transform_indices = @transform_6, window_bounds = array<i64: 1, 2>}, {transform_indices = @transform_7, window_bounds = array<i64: 8, 2>}]} {
    %c0 = arith.constant 0 : index
    %c0_0 = arith.constant 0 : index
    %0 = vector.load %arg1[%c0, %c0_0] : memref<8x4xf32, #tpu.memory_space<vmem>>, vector<8x4xf32>
    %c0_1 = arith.constant 0 : index
    %c0_2 = arith.constant 0 : index
    %1 = vector.load %arg2[%c0_1, %c0_2] : memref<4x32xf32, #tpu.memory_space<vmem>>, vector<4x32xf32>
    %cst = arith.constant dense<0.000000e+00> : vector<8x32xf32>
    %2 = tpu.matmul %0, %1, %cst {dimension_numbers = #tpu.dot_dimension_numbers<[1], [0], [0], [1], [0, 0, 1, 1], [], []>} : vector<8x4xf32>, vector<4x32xf32>, vector<8x32xf32> -> vector<8x32xf32>
    %c0_3 = arith.constant 0 : index
    %c0_4 = arith.constant 0 : index
    %3 = vector.load %arg3[%c0_3, %c0_4] : memref<1x32xf32, #tpu.memory_space<vmem>>, vector<1x32xf32>
    %4 = vector.broadcast %3 : vector<1x32xf32> to vector<8x32xf32>
    %5 = arith.addf %2, %4 : vector<8x32xf32>
    %cst_5 = arith.constant 0.000000e+00 : f32
    %6 = vector.broadcast %cst_5 : f32 to vector<8x32xf32>
    %7 = arith.maximumf %5, %6 : vector<8x32xf32>
    %c0_6 = arith.constant 0 : index
    %c0_7 = arith.constant 0 : index
    %8 = vector.load %arg4[%c0_6, %c0_7] : memref<32x32xf32, #tpu.memory_space<vmem>>, vector<32x32xf32>
    %cst_8 = arith.constant dense<0.000000e+00> : vector<8x32xf32>
    %9 = tpu.matmul %7, %8, %cst_8 {dimension_numbers = #tpu.dot_dimension_numbers<[1], [0], [0], [1], [0, 0, 1, 1], [], []>} : vector<8x32xf32>, vector<32x32xf32>, vector<8x32xf32> -> vector<8x32xf32>
    %c0_9 = arith.constant 0 : index
    %c0_10 = arith.constant 0 : index
    %10 = vector.load %arg5[%c0_9, %c0_10] : memref<1x32xf32, #tpu.memory_space<vmem>>, vector<1x32xf32>
    %11 = vector.broadcast %10 : vector<1x32xf32> to vector<8x32xf32>
    %12 = arith.addf %9, %11 : vector<8x32xf32>
    %cst_11 = arith.constant 0.000000e+00 : f32
    %13 = vector.broadcast %cst_11 : f32 to vector<8x32xf32>
    %14 = arith.maximumf %12, %13 : vector<8x32xf32>
    %c0_12 = arith.constant 0 : index
    %c0_13 = arith.constant 0 : index
    %15 = vector.load %arg6[%c0_12, %c0_13] : memref<32x2xf32, #tpu.memory_space<vmem>>, vector<32x2xf32>
    %cst_14 = arith.constant dense<0.000000e+00> : vector<8x2xf32>
    %16 = tpu.matmul %14, %15, %cst_14 {dimension_numbers = #tpu.dot_dimension_numbers<[1], [0], [0], [1], [0, 0, 1, 1], [], []>} : vector<8x32xf32>, vector<32x2xf32>, vector<8x2xf32> -> vector<8x2xf32>
    %c0_15 = arith.constant 0 : index
    %c0_16 = arith.constant 0 : index
    %17 = vector.load %arg7[%c0_15, %c0_16] : memref<1x2xf32, #tpu.memory_space<vmem>>, vector<1x2xf32>
    %18 = vector.broadcast %17 : vector<1x2xf32> to vector<8x2xf32>
    %19 = arith.addf %16, %18 : vector<8x2xf32>
    %cst_17 = arith.constant dense<0xFF800000> : vector<8xf32>
    %20 = vector.multi_reduction <maximumf>, %19, %cst_17 [1] : vector<8x2xf32> to vector<8xf32>
    %21 = vector.shape_cast %20 : vector<8xf32> to vector<8x1xf32>
    %22 = vector.broadcast %21 : vector<8x1xf32> to vector<8x2xf32>
    %23 = arith.subf %19, %22 : vector<8x2xf32>
    %24 = math.exp %23 : vector<8x2xf32>
    %cst_18 = arith.constant dense<0.000000e+00> : vector<8xf32>
    %25 = vector.multi_reduction <add>, %24, %cst_18 [1] : vector<8x2xf32> to vector<8xf32>
    %26 = vector.shape_cast %25 : vector<8xf32> to vector<8x1xf32>
    %27 = vector.broadcast %26 : vector<8x1xf32> to vector<8x2xf32>
    %28 = arith.divf %24, %27 : vector<8x2xf32>
    %c0_19 = arith.constant 0 : index
    %c0_20 = arith.constant 0 : index
    %29 = vector.load %arg8[%c0_19, %c0_20] : memref<8x2xf32, #tpu.memory_space<vmem>>, vector<8x2xf32>
    tpu.vector_store %arg8[%c0_19, %c0_20], %28 {strides = array<i32>} : memref<8x2xf32, #tpu.memory_space<vmem>>, vector<8x2xf32>,
    return
  }
  func.func @transform_0(%arg0: i32) -> (i32, i32) {
    %c0_i32 = arith.constant 0 : i32
    %c0_i32_0 = arith.constant 0 : i32
    return %arg0, %c0_i32 : i32, i32
  }
  func.func @transform_1(%arg0: i32) -> (i32, i32) {
    %c0_i32 = arith.constant 0 : i32
    %c0_i32_0 = arith.constant 0 : i32
    %c0_i32_1 = arith.constant 0 : i32
    return %c0_i32, %c0_i32_0 : i32, i32
  }
  func.func @transform_2(%arg0: i32) -> (i32, i32) {
    %c0_i32 = arith.constant 0 : i32
    %c0_i32_0 = arith.constant 0 : i32
    %c0_i32_1 = arith.constant 0 : i32
    return %c0_i32, %c0_i32_0 : i32, i32
  }
  func.func @transform_3(%arg0: i32) -> (i32, i32) {
    %c0_i32 = arith.constant 0 : i32
    %c0_i32_0 = arith.constant 0 : i32
    %c0_i32_1 = arith.constant 0 : i32
    return %c0_i32, %c0_i32_0 : i32, i32
  }
  func.func @transform_4(%arg0: i32) -> (i32, i32) {
    %c0_i32 = arith.constant 0 : i32
    %c0_i32_0 = arith.constant 0 : i32
    %c0_i32_1 = arith.constant 0 : i32
    return %c0_i32, %c0_i32_0 : i32, i32
  }
  func.func @transform_5(%arg0: i32) -> (i32, i32) {
    %c0_i32 = arith.constant 0 : i32
    %c0_i32_0 = arith.constant 0 : i32
    %c0_i32_1 = arith.constant 0 : i32
    return %c0_i32, %c0_i32_0 : i32, i32
  }
  func.func @transform_6(%arg0: i32) -> (i32, i32) {
    %c0_i32 = arith.constant 0 : i32
    %c0_i32_0 = arith.constant 0 : i32
    %c0_i32_1 = arith.constant 0 : i32
    return %c0_i32, %c0_i32_0 : i32, i32
  }
  func.func @transform_7(%arg0: i32) -> (i32, i32) {
    %c0_i32 = arith.constant 0 : i32
    %c0_i32_0 = arith.constant 0 : i32
    return %arg0, %c0_i32 : i32, i32
  }
}

</mosaic_0001>

<bundles_post_ra>
// kernel: mlp_forward.1
= control target key start
LH: loop header
LB: loop body
LE: loop exit
PB: predicated region body
PF: predicated region fallthrough
CT: control target
= control target key end

     0   :  { %vm39_vm0 = vcmask 1043456   ;;  %vm35_vm1 = vcmask 31744   ;;  %v366_v0 = vmov 0.0   ;;  %vm367_vm2 = vmmov 0   ;;  %s454_s1 = inlined_call_operand.vmem [shape: f32[4,32], index: 1, kind: input, shape index: {}]   ;;  %s455_s0 = inlined_call_operand.vmem [shape: f32[8,4], index: 0, kind: input, shape index: {}]   ;;  %s456_s3 = inlined_call_operand.vmem [shape: f32[32,32], index: 3, kind: input, shape index: {}]   ;;  %s457_s5 = inlined_call_operand.vmem [shape: f32[32,2], index: 5, kind: input, shape index: {}]   ;;  %s458_s2 = inlined_call_operand.vmem [shape: f32[1,32], index: 2, kind: input, shape index: {}]   ;;  %s459_s4 = inlined_call_operand.vmem [shape: f32[1,32], index: 4, kind: input, shape index: {}]   ;;  %s460_s6 = inlined_call_operand.vmem [shape: f32[1,2], index: 6, kind: input, shape index: {}]   ;;  %s461_s7 = inlined_call_operand.vmem [shape: f32[8,2], index: 7, kind: output, shape index: {}]  }
   0x1   :  { %320 = vmatprep.subr.mxu0 %v366_v0  ;;  %v27_v1 = vld [vmem:[%s454_s1] sm:$0xf]  ;;  %322 = vmatprep.mubr.msk.f32.mxu0 %vm367_vm2, %v366_v0  ;;  %v368_v4 = vmov 0.0|0.0   ;;  %v115_v5 = vld [vmem:[%s456_s3 + $0x8] sm:$0xff]  ;;  %v116_v7 = vld [vmem:[%s456_s3 + $0x10] sm:$0xff]  ;;  %vm125_vm3 = vcmask 261120  }
   0x2   :  { %v26_v2 = vld [vmem:[%s455_s0] sm:$0xff]  ;;  %321 = vmatpush3.msk.msra.mxu0 %vm39_vm0, %v27_v1  ;;  %347 = vmatprep.subr.bf16.mxu1 %v368_v4  ;;  %v117_v8 = vld [vmem:[%s456_s3 + $0x18] sm:$0xff]  ;;  %v201_v11 = vld [vmem:[%s457_s5 + $0x8] sm:$0xff]  ;;  %vm284_vm4 = vcmask 15360  }
   0x3   :  { %v114_v3 = vld [vmem:[%s456_s3] sm:$0xff]  ;;  %323 = vmatmul.mubr.msk.f32.vlgmr.msra.gmra.mrb[0].mxu0 %vm35_vm1, %v26_v2  ;;  %333 = vmatprep.mubr.msk.f32.mxu1 %vm367_vm2, %v366_v0  ;;  %v351_v9 = vpack.c.bf16 %v117_v8, %v116_v7  ;;  %v202_v18 = vld [vmem:[%s457_s5 + $0x10] sm:$0xff]  ;;  %v203_v19 = vld [vmem:[%s457_s5 + $0x18] sm:$0xff] }
   0x4   :  { %v348_v6 = vpack.c.bf16 %v115_v5, %v114_v3  ;;  %353 = vmatprep.subr.bf16.mxu0 %v368_v4  ;;  %344 = vmatprep.mubr.msk.f32.mxu0 %vm367_vm2, %v366_v0  ;;  %v200_v10 = vld [vmem:[%s457_s5] sm:$0xff]  ;;  %v357_v20 = vpack.c.bf16 %v203_v19, %v202_v18 }
   0x5   :  { %v354_v12 = vpack.c.bf16 %v201_v11, %v200_v10  ;;  %v301_v13 = vld [vmem:[%s458_s2] ss:$0 sm:$0xff] }
   0x6   :  { %349 = vmatpush3.bf16.msra.mxu1 %v348_v6  ;;  %v304_v21 = vld [vmem:[%s459_s4] ss:$0 sm:$0xff] }
   0x7   :  { %350 = vmatprep.subr.bf16.mxu1 %v368_v4  ;;  %355 = vmatpush3.bf16.msra.mxu0 %v354_v12  ;;  %v306_v26 = vld [vmem:[%s460_s6] ss:$0 sm:$0xff] }
   0x8   :  { %356 = vmatprep.subr.bf16.mxu0 %v368_v4 }
   0xa   :  { %352 = vmatpush3.bf16.msra.mxu1 %v351_v9 }
   0xb   :  { %358 = vmatpush3.bf16.msra.mxu0 %v357_v20 }
  0xd6   :  { %v109_v14 = vpop.f32.mrb[0].mxu0 }
  0xd7   :  { %v110_v15 = vadd.f32 %v301_v13, %v109_v14  ;;  %v324_v16 = vpop.f32.mrb[1].mxu0 }
  0xd9   :  { %v113_v17 = vmax.f32 %v110_v15, 0.0 }
  0xdb   :  { %334 = vmatmul.mubr.msk.f32.vlgmr.msra.gmra.mrb[0].mxu1 %vm125_vm3, %v113_v17 }
 0x1ae   :  { %v195_v22 = vpop.f32.mrb[0].mxu1 }
 0x1af   :  { %v196_v23 = vadd.f32 %v304_v21, %v195_v22  ;;  %v335_v24 = vpop.f32.mrb[1].mxu1 }
 0x1b1   :  { %v199_v25 = vmax.f32 %v196_v23, 0.0 }
 0x1b3   :  { %345 = vmatmul.mubr.msk.f32.vlgmr.msra.gmra.mrb[2].mxu0 %vm125_vm3, %v199_v25 }
 0x286   :  { %v280_v27 = vpop.f32.mrb[2].mxu0 }
 0x287   :  { %v281_v28 = vadd.f32 %v306_v26, %v280_v27  ;;  %v346_v29 = vpop.f32.mrb[3].mxu0 }
 0x289   :  { %v285_v30 = vsel %vm284_vm4, %v281_v28, -inf }
 0x28a   :  { %286 = vmax.xlane.f32.xlu0 %v285_v30 }
 0x317   :  { %v287_v31 = vpop.xlane.xlu0 %286 }
 0x318   :  { %v288_v32 = vsub.f32 %v281_v28, %v287_v31 }
 0x31a   :  { %v289_v33 = vmul.f32 1.442695, %v288_v32 }
 0x31c   :  { %362 = vpow2.f32 %v289_v33 }
 0x326   :  { %v363_v34 = vpop.eup %362 }
 0x327   :  { %v291_v35 = vsel %vm284_vm4, %v363_v34, 0.0 }
 0x328   :  { %292 = vadd.xlane.f32.xlu0 %v291_v35 }
 0x3b5   :  { %v293_v36 = vpop.xlane.xlu0 %292 }
 0x3b6   :  { %364 = vrcp.f32 %v293_v36 }
 0x3c0   :  { %v365_v37 = vpop.eup %364 }
 0x3c1   :  { %v295_v38 = vmul.f32 %v365_v37, %v363_v34 }
 0x3c3   :  { %296 = vst.msk [vmem:[%s461_s7] sm:$0xff] %vm284_vm4, %v295_v38 }

</bundles_post_ra>
